<compile_context>
chip_gen: v6e
topology: v6e:2x2x1
jax: 0.10.0
libtpu: 0.0.40
codegen_flags: <defaults>
</compile_context>

<pallas_src>
import functools

import jax
import jax.numpy as jnp
import numpy as np
from jax.experimental import pallas as pl
from jax.experimental.pallas import tpu as pltpu

NEG_INF = -1e30  # finite "masked" value: avoids NaN from (-inf) + (-inf)

# rows of the packed bias/scale matrix
_BQKV, _BO, _G1, _BE1, _B1, _B2, _G2, _BE2, _BOUT = range(9)


# ------------------------------------------------------------------ helpers ---
def make_positional_encoding(max_length, embedding_size):
    time = np.pi * np.arange(0, max_length, dtype=np.float32)
    freq_dividers = np.arange(1, embedding_size // 2 + 1, dtype=np.float32)
    inputs = time[:, None] / freq_dividers[None, :]
    result = np.zeros((max_length, embedding_size), dtype=np.float32)
    result[:, 0::2] = np.sin(inputs)
    result[:, 1::2] = np.cos(inputs)
    return jnp.asarray(result)


def make_target_dependency_mask(length):
    idx = np.arange(length)
    mask = np.where(idx[None, :] <= idx[:, None], 0.0, NEG_INF).astype(np.float32)
    return jnp.asarray(mask)


# ------------------------------------------------------------------- kernel ---
def lm_kernel(x_ref, pad_ref, bias_ref,
              wqkv_t_ref, wo_t_ref, w1_t_ref, w2_t_ref, wout_t_ref,
              logits_ref, *, num_heads, seq_len, group, ffn, vpad):
    f32, bf16 = jnp.float32, jnp.bfloat16
    N, E = x_ref.shape            # N = group * seq_len rows in this program
    S, G, H = seq_len, group, num_heads
    Dh = E // H
    eps = 1e-5

    # --- packed biases / LN params (one DMA'd (rows,128) block, static slices) ---
    bqkv = bias_ref[_BQKV:_BQKV + 1, :3 * E]     # (1, 3E)
    bo = bias_ref[_BO:_BO + 1, :E]
    g1 = bias_ref[_G1:_G1 + 1, :E]
    be1 = bias_ref[_BE1:_BE1 + 1, :E]
    b1 = bias_ref[_B1:_B1 + 1, :ffn]
    b2 = bias_ref[_B2:_B2 + 1, :E]
    g2 = bias_ref[_G2:_G2 + 1, :E]
    be2 = bias_ref[_BE2:_BE2 + 1, :E]
    bout = bias_ref[_BOUT:_BOUT + 1, :vpad]

    x = x_ref[...]                               # (N, E) float32
    xb = x.astype(bf16)

    # --- fused QKV projection (one K=E MXU pass), bias add, single bf16 cast ---
    qkv = jnp.dot(xb, wqkv_t_ref[...], preferred_element_type=f32) + bqkv
    qkv = qkv.astype(bf16)                       # cast ONCE for all heads

    # --- boolean attention mask, per sequence: causal & key-not-pad (no (N,N) f32) ---
    r = jax.lax.broadcasted_iota(jnp.int32, (S, S), 0)
    c = jax.lax.broadcasted_iota(jnp.int32, (S, S), 1)
    causal_ok = c <= r                                         # (S, S)
    key_ok = pad_ref[0] == 0                                   # (G, S) keys
    allowed = jnp.logical_and(causal_ok[None], key_ok[:, None, :])   # (G, S, S)

    scale = 1.0 / jnp.sqrt(jnp.float32(Dh))

    # --- per-head attention, batched over the G sequences of this program -------
    head_outs = []
    for h in range(H):
        # lane-aligned free views once Dh >= 128; small relayout at toy Dh
        qh = qkv[:, h * Dh:(h + 1) * Dh].reshape(G, S, Dh)
        kh = qkv[:, E + h * Dh:E + (h + 1) * Dh].reshape(G, S, Dh)
        vh = qkv[:, 2 * E + h * Dh:2 * E + (h + 1) * Dh].reshape(G, S, Dh)

        s = jnp.einsum('gqd,gkd->gqk', qh, kh,
                       preferred_element_type=f32) * scale     # (G, S, S)
        s = jnp.where(allowed, s, NEG_INF)
        s = s - jnp.max(s, axis=-1, keepdims=True)
        p = jnp.exp(s)
        p = p * pl.reciprocal(jnp.sum(p, axis=-1, keepdims=True), approx=True)
        oh = jnp.einsum('gqk,gkd->gqd', p.astype(bf16), vh,
                        preferred_element_type=f32)            # (G, S, Dh)
        head_outs.append(oh.reshape(N, Dh))

    # head-major concat -> ONE K=E output projection (instead of H K=Dh folds)
    attn = jnp.concatenate(head_outs, axis=-1).astype(bf16)     # (N, E)
    sa = jnp.dot(attn, wo_t_ref[...], preferred_element_type=f32) + bo

    # --- residual + LayerNorm 1 (post-norm) ---
    h1 = x + sa
    mu = jnp.mean(h1, axis=-1, keepdims=True)
    var = jnp.mean((h1 - mu) ** 2, axis=-1, keepdims=True)
    h1 = (h1 - mu) * jax.lax.rsqrt(var + eps) * g1 + be1

    # --- feed-forward (ReLU) over all rows ---
    ff = jnp.dot(h1.astype(bf16), w1_t_ref[...], preferred_element_type=f32) + b1
    ff = jnp.maximum(ff, 0.0)
    ff = jnp.dot(ff.astype(bf16), w2_t_ref[...], preferred_element_type=f32) + b2

    # --- residual + LayerNorm 2 ---
    h2 = h1 + ff
    mu2 = jnp.mean(h2, axis=-1, keepdims=True)
    var2 = jnp.mean((h2 - mu2) ** 2, axis=-1, keepdims=True)
    h2 = (h2 - mu2) * jax.lax.rsqrt(var2 + eps) * g2 + be2

    # --- vocab projection into a lane-dense (multiple-of-128) padded block ---
    logits = jnp.dot(h2.astype(bf16), wout_t_ref[...],
                     preferred_element_type=f32) + bout
    logits_ref[...] = logits.astype(logits_ref.dtype)


# ------------------------------------------------------------------ wrapper ---
def language_model_forward(token_ids, params, *, num_heads, batch_blocks=None):
    B, S = token_ids.shape
    E = params["emb"].shape[1]
    F = params["w1"].shape[0]
    V = params["wout"].shape[0]
    V_pad = ((V + 127) // 128) * 128            # lane-dense output (pad vocab to 128)
    f32, bf16 = jnp.float32, jnp.bfloat16

    if batch_blocks is None:
        # Group ~256 rows per program to amortize MXU push/drain + per-step cost,
        # but keep >=2 programs when B allows so both v7x TensorCores get work.
        group_target = max(1, 256 // S)
        batch_blocks = max(1, B // group_target)
        if B % 2 == 0:
            batch_blocks = max(batch_blocks, 2)
        while B % batch_blocks:
            batch_blocks -= 1
    assert B % batch_blocks == 0
    G = B // batch_blocks                        # sequences per program
    rows_per_block = G * S
    # VMEM/program ~ S^2*G*4B (per-head scores) + rows*(3E+F+V_pad)*4B + weights;
    # tiny here, and per-sequence attention keeps it linear in G on v7x's 64 MiB.

    # glue: embedding lookup (padding_idx=0 row is zero) + positional encoding,
    # then flatten batch*seq rows so the kernel does pure MXU matmuls.
    x = params["emb"][token_ids] + make_positional_encoding(S, E)[None]
    x = x.reshape(B * S, E).astype(f32)
    # emb_dropout / layer dropouts have p=0.0 (eval) -> identity

    # key-padding flags grouped per batch block: (batch_blocks, G, S) int32
    pad_flags = (token_ids == 0).astype(jnp.int32).reshape(batch_blocks, G, S)

    # pack all tiny bias / LayerNorm vectors into one lane-dense f32 block (1 DMA)
    width = max(3 * E, F, V_pad, 128)
    width = ((width + 127) // 128) * 128
    bias_pack = jnp.zeros((9, width), f32)
    bias_pack = bias_pack.at[_BQKV, :3 * E].set(params["bqkv"].reshape(-1).astype(f32))
    bias_pack = bias_pack.at[_BO, :E].set(params["bo"].reshape(-1).astype(f32))
    bias_pack = bias_pack.at[_G1, :E].set(params["g1"].reshape(-1).astype(f32))
    bias_pack = bias_pack.at[_BE1, :E].set(params["be1"].reshape(-1).astype(f32))
    bias_pack = bias_pack.at[_B1, :F].set(params["b1"].reshape(-1).astype(f32))
    bias_pack = bias_pack.at[_B2, :E].set(params["b2"].reshape(-1).astype(f32))
    bias_pack = bias_pack.at[_G2, :E].set(params["g2"].reshape(-1).astype(f32))
    bias_pack = bias_pack.at[_BE2, :E].set(params["be2"].reshape(-1).astype(f32))
    bias_pack = bias_pack.at[_BOUT, :V].set(params["bout"].reshape(-1).astype(f32))

    # weights: pre-transpose once, bf16 MXU operands, pad vocab dim to 128 lanes.
    wqkv_t = params["wqkv"].T.astype(bf16)                       # (E, 3E)
    wo_t = params["wo"].T.astype(bf16)                           # (E, E) head-major rows
    w1_t = params["w1"].T.astype(bf16)                           # (E, F)
    w2_t = params["w2"].T.astype(bf16)                           # (F, E)
    wout_t = jnp.zeros((E, V_pad), bf16).at[:, :V].set(params["wout"].T.astype(bf16))

    weights = (wqkv_t, wo_t, w1_t, w2_t, wout_t)

    def full_block(a):
        nd = a.ndim
        return pl.BlockSpec(a.shape, lambda i, _nd=nd: (0,) * _nd)

    in_specs = [
        pl.BlockSpec((rows_per_block, E), lambda i: (i, 0)),      # activations
        pl.BlockSpec((1, G, S), lambda i: (i, 0, 0)),             # key-padding flags
        full_block(bias_pack),                                    # packed biases
    ] + [full_block(w) for w in weights]
    out_spec = pl.BlockSpec((rows_per_block, V_pad), lambda i: (i, 0))

    kernel = functools.partial(lm_kernel, num_heads=num_heads, seq_len=S,
                               group=G, ffn=F, vpad=V_pad)
    logits = pl.pallas_call(
        kernel,
        out_shape=jax.ShapeDtypeStruct((B * S, V_pad), f32),
        grid=(batch_blocks,),      # "parallel" -> shards across v7x's 2 TensorCores
        in_specs=in_specs,
        out_specs=out_spec,
        compiler_params=pltpu.CompilerParams(dimension_semantics=("parallel",)),
    )(x, pad_flags, bias_pack, *weights)

    # TODO(synk): for realistic vocab sizes (V >= ~8k) add a grid axis tiling
    # wout_t / logits over lane-dense 512-1024 column blocks (and K-tile the FFN)
    # so weight DMA double-buffers behind MXU work and the logits block stays
    # inside v7x's 64 MiB VMEM.
    return logits[:, :V].reshape(B, S, V)


# ---------------------------------------------------------- pure-JAX reference ---
def reference_forward(token_ids, params, *, num_heads):
    B, S = token_ids.shape
    E = params["emb"].shape[1]
    Dh = E // num_heads
    eps = 1e-5

    x = params["emb"][token_ids] + make_positional_encoding(S, E)[None]
    causal = make_target_dependency_mask(S)
    kbias = jnp.where(token_ids == 0, NEG_INF, 0.0).astype(jnp.float32)

    def per_batch(xb, kb):
        qkv = xb @ params["wqkv"].T + params["bqkv"][0]
        scale = 1.0 / jnp.sqrt(jnp.float32(Dh))
        outs = []
        for h in range(num_heads):
            qh = qkv[:, h * Dh:(h + 1) * Dh]
            kh = qkv[:, E + h * Dh:E + (h + 1) * Dh]
            vh = qkv[:, 2 * E + h * Dh:2 * E + (h + 1) * Dh]
            s = qh @ kh.T * scale + causal + kb[None, :]
            s = s - jnp.max(s, axis=-1, keepdims=True)
            p = jnp.exp(s)
            p = p / jnp.sum(p, axis=-1, keepdims=True)
            outs.append(p @ vh)
        attn = jnp.concatenate(outs, axis=-1)
        sa = attn @ params["wo"].T + params["bo"][0]
        h1 = xb + sa
        mu = jnp.mean(h1, -1, keepdims=True)
        var = jnp.mean((h1 - mu) ** 2, -1, keepdims=True)
        h1 = (h1 - mu) * jax.lax.rsqrt(var + eps) * params["g1"][0] + params["be1"][0]
        ff = jnp.maximum(h1 @ params["w1"].T + params["b1"][0], 0.0)
        ff = ff @ params["w2"].T + params["b2"][0]
        h2 = h1 + ff
        mu2 = jnp.mean(h2, -1, keepdims=True)
        var2 = jnp.mean((h2 - mu2) ** 2, -1, keepdims=True)
        h2 = (h2 - mu2) * jax.lax.rsqrt(var2 + eps) * params["g2"][0] + params["be2"][0]
        return h2 @ params["wout"].T + params["bout"][0]

    return jax.vmap(per_batch)(x, kbias)


# --------------------------------------------------------------------- setup ---
def init_params(key, vocab, E, F):
    ks = jax.random.split(key, 10)

    def nrm(k, shape, scale=0.02):
        return scale * jax.random.normal(k, shape, dtype=jnp.float32)

    emb = nrm(ks[0], (vocab, E), 1.0)
    emb = emb.at[0].set(0.0)  # nn.Embedding(padding_idx=0) zeroes row 0
    return dict(
        emb=emb,
        wqkv=nrm(ks[1], (3 * E, E)),
        bqkv=nrm(ks[2], (1, 3 * E)),
        wo=nrm(ks[3], (E, E)),
        bo=nrm(ks[4], (1, E)),
        g1=jnp.ones((1, E), jnp.float32),
        be1=jnp.zeros((1, E), jnp.float32),
        w1=nrm(ks[5], (F, E)),
        b1=nrm(ks[6], (1, F)),
        w2=nrm(ks[7], (E, F)),
        b2=nrm(ks[8], (1, E)),
        g2=jnp.ones((1, E), jnp.float32),
        be2=jnp.zeros((1, E), jnp.float32),
        wout=nrm(ks[9], (vocab, E)),
        bout=jnp.zeros((1, vocab), jnp.float32),
    )


if __name__ == "__main__":
    VOCAB, E, HEADS, FF = 50, 32, 4, 64
    B, S = 2, 8

    key = jax.random.PRNGKey(0)
    k_tok, k_par = jax.random.split(key)
    params = init_params(k_par, VOCAB, E, FF)

    # deterministic token ids with trailing padding (token id 0 == pad)
    ids = jax.random.randint(k_tok, (B, S), 1, VOCAB, dtype=jnp.int32)
    pad_len = jnp.array([2, 3], dtype=jnp.int32)
    pos = jnp.arange(S, dtype=jnp.int32)
    ids = jnp.where(pos[None, :] >= (S - pad_len)[:, None], 0, ids)

    fwd = jax.jit(functools.partial(language_model_forward, num_heads=HEADS))
    logits = jax.block_until_ready(fwd(ids, params))

    ref = reference_forward(ids, params, num_heads=HEADS)
    assert logits.shape == (B, S, VOCAB)
    assert bool(jnp.all(jnp.isfinite(logits)))
    err = float(jnp.max(jnp.abs(logits - ref)))
    # bf16 MXU operands + approx reciprocal vs f32 reference
    assert err < 2e-2, f"max abs err {err}"

    print("KERNEL_OK")
</pallas_src>

<mosaic_0001>
module attributes {stable_mosaic.version = 11 : i64} {
  func.func @lm_kernel(%arg0: i32, %arg1: memref<8x32xf32, #tpu.memory_space<vmem>>, %arg2: memref<1x1x8xi32, #tpu.memory_space<vmem>>, %arg3: memref<9x128xf32, #tpu.memory_space<vmem>>, %arg4: memref<32x96xbf16, #tpu.memory_space<vmem>>, %arg5: memref<32x32xbf16, #tpu.memory_space<vmem>>, %arg6: memref<32x64xbf16, #tpu.memory_space<vmem>>, %arg7: memref<64x32xbf16, #tpu.memory_space<vmem>>, %arg8: memref<32x128xbf16, #tpu.memory_space<vmem>>, %arg9: memref<8x128xf32, #tpu.memory_space<vmem>>) attributes {dimension_semantics = [#tpu.dimension_semantics<parallel>], iteration_bounds = array<i64: 2>, scalar_prefetch = 0 : i64, scratch_operands = 0 : i64, tpu.core_type = #tpu.core_type<tc>, window_params = [{transform_indices = @transform_0, window_bounds = array<i64: 8, 32>}, {transform_indices = @transform_1, window_bounds = array<i64: 1, 1, 8>}, {pipeline_mode = #tpu.pipeline_mode<synchronous>, transform_indices = @transform_2, window_bounds = array<i64: 9, 128>}, {pipeline_mode = #tpu.pipeline_mode<synchronous>, transform_indices = @transform_3, window_bounds = array<i64: 32, 96>}, {pipeline_mode = #tpu.pipeline_mode<synchronous>, transform_indices = @transform_4, window_bounds = array<i64: 32, 32>}, {pipeline_mode = #tpu.pipeline_mode<synchronous>, transform_indices = @transform_5, window_bounds = array<i64: 32, 64>}, {pipeline_mode = #tpu.pipeline_mode<synchronous>, transform_indices = @transform_6, window_bounds = array<i64: 64, 32>}, {pipeline_mode = #tpu.pipeline_mode<synchronous>, transform_indices = @transform_7, window_bounds = array<i64: 32, 128>}, {transform_indices = @transform_8, window_bounds = array<i64: 8, 128>}]} {
    %c0 = arith.constant 0 : index
    %c0_0 = arith.constant 0 : index
    %0 = vector.load %arg3[%c0, %c0_0] : memref<9x128xf32, #tpu.memory_space<vmem>>, vector<1x96xf32>
    %c1 = arith.constant 1 : index
    %c0_1 = arith.constant 0 : index
    %1 = vector.load %arg3[%c1, %c0_1] : memref<9x128xf32, #tpu.memory_space<vmem>>, vector<1x32xf32>
    %c2 = arith.constant 2 : index
    %c0_2 = arith.constant 0 : index
    %2 = vector.load %arg3[%c2, %c0_2] : memref<9x128xf32, #tpu.memory_space<vmem>>, vector<1x32xf32>
    %c3 = arith.constant 3 : index
    %c0_3 = arith.constant 0 : index
    %3 = vector.load %arg3[%c3, %c0_3] : memref<9x128xf32, #tpu.memory_space<vmem>>, vector<1x32xf32>
    %c4 = arith.constant 4 : index
    %c0_4 = arith.constant 0 : index
    %4 = vector.load %arg3[%c4, %c0_4] : memref<9x128xf32, #tpu.memory_space<vmem>>, vector<1x64xf32>
    %c5 = arith.constant 5 : index
    %c0_5 = arith.constant 0 : index
    %5 = vector.load %arg3[%c5, %c0_5] : memref<9x128xf32, #tpu.memory_space<vmem>>, vector<1x32xf32>
    %c6 = arith.constant 6 : index
    %c0_6 = arith.constant 0 : index
    %6 = vector.load %arg3[%c6, %c0_6] : memref<9x128xf32, #tpu.memory_space<vmem>>, vector<1x32xf32>
    %c7 = arith.constant 7 : index
    %c0_7 = arith.constant 0 : index
    %7 = vector.load %arg3[%c7, %c0_7] : memref<9x128xf32, #tpu.memory_space<vmem>>, vector<1x32xf32>
    %c8 = arith.constant 8 : index
    %c0_8 = arith.constant 0 : index
    %8 = vector.load %arg3[%c8, %c0_8] : memref<9x128xf32, #tpu.memory_space<vmem>>, vector<1x128xf32>
    %c0_9 = arith.constant 0 : index
    %c0_10 = arith.constant 0 : index
    %9 = vector.load %arg1[%c0_9, %c0_10] : memref<8x32xf32, #tpu.memory_space<vmem>>, vector<8x32xf32>
    %10 = arith.truncf %9 : vector<8x32xf32> to vector<8x32xbf16>
    %c0_11 = arith.constant 0 : index
    %c0_12 = arith.constant 0 : index
    %11 = vector.load %arg4[%c0_11, %c0_12] : memref<32x96xbf16, #tpu.memory_space<vmem>>, vector<32x96xbf16>
    %cst = arith.constant dense<0.000000e+00> : vector<8x96xf32>
    %12 = tpu.matmul %10, %11, %cst {dimension_numbers = #tpu.dot_dimension_numbers<[1], [0], [0], [1], [0, 0, 1, 1], [], []>} : vector<8x32xbf16>, vector<32x96xbf16>, vector<8x96xf32> -> vector<8x96xf32>
    %13 = vector.broadcast %0 : vector<1x96xf32> to vector<8x96xf32>
    %14 = arith.addf %12, %13 : vector<8x96xf32>
    %15 = arith.truncf %14 : vector<8x96xf32> to vector<8x96xbf16>
    %16 = tpu.iota {dimensions = array<i32: 0>} : vector<8x8xi32>
    %17 = tpu.iota {dimensions = array<i32: 1>} : vector<8x8xi32>
    %18 = arith.cmpi sle, %17, %16 : vector<8x8xi32>
    %c0_13 = arith.constant 0 : index
    %c0_14 = arith.constant 0 : index
    %c0_15 = arith.constant 0 : index
    %19 = vector.load %arg2[%c0_13, %c0_14, %c0_15] : memref<1x1x8xi32, #tpu.memory_space<vmem>>, vector<1x1x8xi32>
    %20 = vector.shape_cast %19 : vector<1x1x8xi32> to vector<1x8xi32>
    %c0_i32 = arith.constant 0 : i32
    %21 = vector.broadcast %c0_i32 : i32 to vector<1x8xi32>
    %22 = arith.cmpi eq, %20, %21 : vector<1x8xi32>
    %23 = vector.shape_cast %18 : vector<8x8xi1> to vector<1x8x8xi1>
    %24 = vector.shape_cast %22 : vector<1x8xi1> to vector<1x1x8xi1>
    %25 = vector.broadcast %24 : vector<1x1x8xi1> to vector<1x8x8xi1>
    %26 = arith.andi %23, %25 : vector<1x8x8xi1>
    %cst_16 = arith.constant 8.000000e+00 : f32
    %27 = math.sqrt %cst_16 : f32
    %cst_17 = arith.constant 1.000000e+00 : f32
    %28 = arith.divf %cst_17, %27 : f32
    %29 = vector.extract_strided_slice %15 {offsets = [0, 0], sizes = [8, 8], strides = [1, 1]} : vector<8x96xbf16> to vector<8x8xbf16>
    %30 = vector.shape_cast %29 : vector<8x8xbf16> to vector<1x8x8xbf16>
    %31 = vector.extract_strided_slice %15 {offsets = [0, 32], sizes = [8, 8], strides = [1, 1]} : vector<8x96xbf16> to vector<8x8xbf16>
    %32 = vector.shape_cast %31 : vector<8x8xbf16> to vector<1x8x8xbf16>
    %33 = vector.extract_strided_slice %15 {offsets = [0, 64], sizes = [8, 8], strides = [1, 1]} : vector<8x96xbf16> to vector<8x8xbf16>
    %34 = vector.shape_cast %33 : vector<8x8xbf16> to vector<1x8x8xbf16>
    "tpu.trace_start"() <{level = 10 : i32, message = "gqd,gkd->gqk"}> : () -> ()
    %cst_18 = arith.constant dense<0.000000e+00> : vector<1x8x8xf32>
    %35 = tpu.matmul %30, %32, %cst_18 {dimension_numbers = #tpu.dot_dimension_numbers<[2], [2], [1], [1], [0, 0, 0, 1, 1, 1], [0], [0]>} : vector<1x8x8xbf16>, vector<1x8x8xbf16>, vector<1x8x8xf32> -> vector<1x8x8xf32>
    "tpu.trace_stop"() : () -> ()
    %36 = vector.broadcast %28 : f32 to vector<1x8x8xf32>
    %37 = arith.mulf %35, %36 : vector<1x8x8xf32>
    %cst_19 = arith.constant -1.000000e+30 : f32
    %38 = vector.broadcast %cst_19 : f32 to vector<1x8x8xf32>
    %39 = arith.select %26, %37, %38 : vector<1x8x8xi1>, vector<1x8x8xf32>
    %cst_20 = arith.constant dense<0xFF800000> : vector<1x8xf32>
    %40 = vector.multi_reduction <maximumf>, %39, %cst_20 [2] : vector<1x8x8xf32> to vector<1x8xf32>
    %41 = vector.shape_cast %40 : vector<1x8xf32> to vector<1x8x1xf32>
    %42 = vector.broadcast %41 : vector<1x8x1xf32> to vector<1x8x8xf32>
    %43 = arith.subf %39, %42 : vector<1x8x8xf32>
    %44 = math.exp %43 : vector<1x8x8xf32>
    %cst_21 = arith.constant dense<0.000000e+00> : vector<1x8xf32>
    %45 = vector.multi_reduction <add>, %44, %cst_21 [2] : vector<1x8x8xf32> to vector<1x8xf32>
    %46 = vector.shape_cast %45 : vector<1x8xf32> to vector<1x8x1xf32>
    %47 = tpu.reciprocal %46 {approx = true} : vector<1x8x1xf32> -> vector<1x8x1xf32>
    %48 = vector.broadcast %47 : vector<1x8x1xf32> to vector<1x8x8xf32>
    %49 = arith.mulf %44, %48 : vector<1x8x8xf32>
    %50 = arith.truncf %49 : vector<1x8x8xf32> to vector<1x8x8xbf16>
    "tpu.trace_start"() <{level = 10 : i32, message = "gqk,gkd->gqd"}> : () -> ()
    %cst_22 = arith.constant dense<0.000000e+00> : vector<1x8x8xf32>
    %51 = tpu.matmul %50, %34, %cst_22 {dimension_numbers = #tpu.dot_dimension_numbers<[2], [1], [1], [2], [0, 0, 0, 1, 1, 2], [0], [0]>} : vector<1x8x8xbf16>, vector<1x8x8xbf16>, vector<1x8x8xf32> -> vector<1x8x8xf32>
    "tpu.trace_stop"() : () -> ()
    %52 = vector.shape_cast %51 : vector<1x8x8xf32> to vector<8x8xf32>
    %53 = vector.extract_strided_slice %15 {offsets = [0, 8], sizes = [8, 8], strides = [1, 1]} : vector<8x96xbf16> to vector<8x8xbf16>
    %54 = vector.shape_cast %53 : vector<8x8xbf16> to vector<1x8x8xbf16>
    %55 = vector.extract_strided_slice %15 {offsets = [0, 40], sizes = [8, 8], strides = [1, 1]} : vector<8x96xbf16> to vector<8x8xbf16>
    %56 = vector.shape_cast %55 : vector<8x8xbf16> to vector<1x8x8xbf16>
    %57 = vector.extract_strided_slice %15 {offsets = [0, 72], sizes = [8, 8], strides = [1, 1]} : vector<8x96xbf16> to vector<8x8xbf16>
    %58 = vector.shape_cast %57 : vector<8x8xbf16> to vector<1x8x8xbf16>
    "tpu.trace_start"() <{level = 10 : i32, message = "gqd,gkd->gqk"}> : () -> ()
    %cst_23 = arith.constant dense<0.000000e+00> : vector<1x8x8xf32>
    %59 = tpu.matmul %54, %56, %cst_23 {dimension_numbers = #tpu.dot_dimension_numbers<[2], [2], [1], [1], [0, 0, 0, 1, 1, 1], [0], [0]>} : vector<1x8x8xbf16>, vector<1x8x8xbf16>, vector<1x8x8xf32> -> vector<1x8x8xf32>
    "tpu.trace_stop"() : () -> ()
    %60 = vector.broadcast %28 : f32 to vector<1x8x8xf32>
    %61 = arith.mulf %59, %60 : vector<1x8x8xf32>
    %cst_24 = arith.constant -1.000000e+30 : f32
    %62 = vector.broadcast %cst_24 : f32 to vector<1x8x8xf32>
    %63 = arith.select %26, %61, %62 : vector<1x8x8xi1>, vector<1x8x8xf32>
    %cst_25 = arith.constant dense<0xFF800000> : vector<1x8xf32>
    %64 = vector.multi_reduction <maximumf>, %63, %cst_25 [2] : vector<1x8x8xf32> to vector<1x8xf32>
    %65 = vector.shape_cast %64 : vector<1x8xf32> to vector<1x8x1xf32>
    %66 = vector.broadcast %65 : vector<1x8x1xf32> to vector<1x8x8xf32>
    %67 = arith.subf %63, %66 : vector<1x8x8xf32>
    %68 = math.exp %67 : vector<1x8x8xf32>
    %cst_26 = arith.constant dense<0.000000e+00> : vector<1x8xf32>
    %69 = vector.multi_reduction <add>, %68, %cst_26 [2] : vector<1x8x8xf32> to vector<1x8xf32>
    %70 = vector.shape_cast %69 : vector<1x8xf32> to vector<1x8x1xf32>
    %71 = tpu.reciprocal %70 {approx = true} : vector<1x8x1xf32> -> vector<1x8x1xf32>
    %72 = vector.broadcast %71 : vector<1x8x1xf32> to vector<1x8x8xf32>
    %73 = arith.mulf %68, %72 : vector<1x8x8xf32>
    %74 = arith.truncf %73 : vector<1x8x8xf32> to vector<1x8x8xbf16>
    "tpu.trace_start"() <{level = 10 : i32, message = "gqk,gkd->gqd"}> : () -> ()
    %cst_27 = arith.constant dense<0.000000e+00> : vector<1x8x8xf32>
    %75 = tpu.matmul %74, %58, %cst_27 {dimension_numbers = #tpu.dot_dimension_numbers<[2], [1], [1], [2], [0, 0, 0, 1, 1, 2], [0], [0]>} : vector<1x8x8xbf16>, vector<1x8x8xbf16>, vector<1x8x8xf32> -> vector<1x8x8xf32>
    "tpu.trace_stop"() : () -> ()
    %76 = vector.shape_cast %75 : vector<1x8x8xf32> to vector<8x8xf32>
    %77 = vector.extract_strided_slice %15 {offsets = [0, 16], sizes = [8, 8], strides = [1, 1]} : vector<8x96xbf16> to vector<8x8xbf16>
    %78 = vector.shape_cast %77 : vector<8x8xbf16> to vector<1x8x8xbf16>
    %79 = vector.extract_strided_slice %15 {offsets = [0, 48], sizes = [8, 8], strides = [1, 1]} : vector<8x96xbf16> to vector<8x8xbf16>
    %80 = vector.shape_cast %79 : vector<8x8xbf16> to vector<1x8x8xbf16>
    %81 = vector.extract_strided_slice %15 {offsets = [0, 80], sizes = [8, 8], strides = [1, 1]} : vector<8x96xbf16> to vector<8x8xbf16>
    %82 = vector.shape_cast %81 : vector<8x8xbf16> to vector<1x8x8xbf16>
    "tpu.trace_start"() <{level = 10 : i32, message = "gqd,gkd->gqk"}> : () -> ()
    %cst_28 = arith.constant dense<0.000000e+00> : vector<1x8x8xf32>
    %83 = tpu.matmul %78, %80, %cst_28 {dimension_numbers = #tpu.dot_dimension_numbers<[2], [2], [1], [1], [0, 0, 0, 1, 1, 1], [0], [0]>} : vector<1x8x8xbf16>, vector<1x8x8xbf16>, vector<1x8x8xf32> -> vector<1x8x8xf32>
    "tpu.trace_stop"() : () -> ()
    %84 = vector.broadcast %28 : f32 to vector<1x8x8xf32>
    %85 = arith.mulf %83, %84 : vector<1x8x8xf32>
    %cst_29 = arith.constant -1.000000e+30 : f32
    %86 = vector.broadcast %cst_29 : f32 to vector<1x8x8xf32>
    %87 = arith.select %26, %85, %86 : vector<1x8x8xi1>, vector<1x8x8xf32>
    %cst_30 = arith.constant dense<0xFF800000> : vector<1x8xf32>
    %88 = vector.multi_reduction <maximumf>, %87, %cst_30 [2] : vector<1x8x8xf32> to vector<1x8xf32>
    %89 = vector.shape_cast %88 : vector<1x8xf32> to vector<1x8x1xf32>
    %90 = vector.broadcast %89 : vector<1x8x1xf32> to vector<1x8x8xf32>
    %91 = arith.subf %87, %90 : vector<1x8x8xf32>
    %92 = math.exp %91 : vector<1x8x8xf32>
    %cst_31 = arith.constant dense<0.000000e+00> : vector<1x8xf32>
    %93 = vector.multi_reduction <add>, %92, %cst_31 [2] : vector<1x8x8xf32> to vector<1x8xf32>
    %94 = vector.shape_cast %93 : vector<1x8xf32> to vector<1x8x1xf32>
    %95 = tpu.reciprocal %94 {approx = true} : vector<1x8x1xf32> -> vector<1x8x1xf32>
    %96 = vector.broadcast %95 : vector<1x8x1xf32> to vector<1x8x8xf32>
    %97 = arith.mulf %92, %96 : vector<1x8x8xf32>
    %98 = arith.truncf %97 : vector<1x8x8xf32> to vector<1x8x8xbf16>
    "tpu.trace_start"() <{level = 10 : i32, message = "gqk,gkd->gqd"}> : () -> ()
    %cst_32 = arith.constant dense<0.000000e+00> : vector<1x8x8xf32>
    %99 = tpu.matmul %98, %82, %cst_32 {dimension_numbers = #tpu.dot_dimension_numbers<[2], [1], [1], [2], [0, 0, 0, 1, 1, 2], [0], [0]>} : vector<1x8x8xbf16>, vector<1x8x8xbf16>, vector<1x8x8xf32> -> vector<1x8x8xf32>
    "tpu.trace_stop"() : () -> ()
    %100 = vector.shape_cast %99 : vector<1x8x8xf32> to vector<8x8xf32>
    %101 = vector.extract_strided_slice %15 {offsets = [0, 24], sizes = [8, 8], strides = [1, 1]} : vector<8x96xbf16> to vector<8x8xbf16>
    %102 = vector.shape_cast %101 : vector<8x8xbf16> to vector<1x8x8xbf16>
    %103 = vector.extract_strided_slice %15 {offsets = [0, 56], sizes = [8, 8], strides = [1, 1]} : vector<8x96xbf16> to vector<8x8xbf16>
    %104 = vector.shape_cast %103 : vector<8x8xbf16> to vector<1x8x8xbf16>
    %105 = vector.extract_strided_slice %15 {offsets = [0, 88], sizes = [8, 8], strides = [1, 1]} : vector<8x96xbf16> to vector<8x8xbf16>
    %106 = vector.shape_cast %105 : vector<8x8xbf16> to vector<1x8x8xbf16>
    "tpu.trace_start"() <{level = 10 : i32, message = "gqd,gkd->gqk"}> : () -> ()
    %cst_33 = arith.constant dense<0.000000e+00> : vector<1x8x8xf32>
    %107 = tpu.matmul %102, %104, %cst_33 {dimension_numbers = #tpu.dot_dimension_numbers<[2], [2], [1], [1], [0, 0, 0, 1, 1, 1], [0], [0]>} : vector<1x8x8xbf16>, vector<1x8x8xbf16>, vector<1x8x8xf32> -> vector<1x8x8xf32>
    "tpu.trace_stop"() : () -> ()
    %108 = vector.broadcast %28 : f32 to vector<1x8x8xf32>
    %109 = arith.mulf %107, %108 : vector<1x8x8xf32>
    %cst_34 = arith.constant -1.000000e+30 : f32
    %110 = vector.broadcast %cst_34 : f32 to vector<1x8x8xf32>
    %111 = arith.select %26, %109, %110 : vector<1x8x8xi1>, vector<1x8x8xf32>
    %cst_35 = arith.constant dense<0xFF800000> : vector<1x8xf32>
    %112 = vector.multi_reduction <maximumf>, %111, %cst_35 [2] : vector<1x8x8xf32> to vector<1x8xf32>
    %113 = vector.shape_cast %112 : vector<1x8xf32> to vector<1x8x1xf32>
    %114 = vector.broadcast %113 : vector<1x8x1xf32> to vector<1x8x8xf32>
    %115 = arith.subf %111, %114 : vector<1x8x8xf32>
    %116 = math.exp %115 : vector<1x8x8xf32>
    %cst_36 = arith.constant dense<0.000000e+00> : vector<1x8xf32>
    %117 = vector.multi_reduction <add>, %116, %cst_36 [2] : vector<1x8x8xf32> to vector<1x8xf32>
    %118 = vector.shape_cast %117 : vector<1x8xf32> to vector<1x8x1xf32>
    %119 = tpu.reciprocal %118 {approx = true} : vector<1x8x1xf32> -> vector<1x8x1xf32>
    %120 = vector.broadcast %119 : vector<1x8x1xf32> to vector<1x8x8xf32>
    %121 = arith.mulf %116, %120 : vector<1x8x8xf32>
    %122 = arith.truncf %121 : vector<1x8x8xf32> to vector<1x8x8xbf16>
    "tpu.trace_start"() <{level = 10 : i32, message = "gqk,gkd->gqd"}> : () -> ()
    %cst_37 = arith.constant dense<0.000000e+00> : vector<1x8x8xf32>
    %123 = tpu.matmul %122, %106, %cst_37 {dimension_numbers = #tpu.dot_dimension_numbers<[2], [1], [1], [2], [0, 0, 0, 1, 1, 2], [0], [0]>} : vector<1x8x8xbf16>, vector<1x8x8xbf16>, vector<1x8x8xf32> -> vector<1x8x8xf32>
    "tpu.trace_stop"() : () -> ()
    %124 = vector.shape_cast %123 : vector<1x8x8xf32> to vector<8x8xf32>
    %125 = tpu.concatenate %52, %76, %100, %124 in 1 : vector<8x8xf32>, vector<8x8xf32>, vector<8x8xf32>, vector<8x8xf32> -> vector<8x32xf32>
    %126 = arith.truncf %125 : vector<8x32xf32> to vector<8x32xbf16>
    %c0_38 = arith.constant 0 : index
    %c0_39 = arith.constant 0 : index
    %127 = vector.load %arg5[%c0_38, %c0_39] : memref<32x32xbf16, #tpu.memory_space<vmem>>, vector<32x32xbf16>
    %cst_40 = arith.constant dense<0.000000e+00> : vector<8x32xf32>
    %128 = tpu.matmul %126, %127, %cst_40 {dimension_numbers = #tpu.dot_dimension_numbers<[1], [0], [0], [1], [0, 0, 1, 1], [], []>} : vector<8x32xbf16>, vector<32x32xbf16>, vector<8x32xf32> -> vector<8x32xf32>
    %129 = vector.broadcast %1 : vector<1x32xf32> to vector<8x32xf32>
    %130 = arith.addf %128, %129 : vector<8x32xf32>
    %131 = arith.addf %9, %130 : vector<8x32xf32>
    %cst_41 = arith.constant dense<0.000000e+00> : vector<8xf32>
    %132 = vector.multi_reduction <add>, %131, %cst_41 [1] : vector<8x32xf32> to vector<8xf32>
    %133 = vector.shape_cast %132 : vector<8xf32> to vector<8x1xf32>
    %cst_42 = arith.constant 3.200000e+01 : f32
    %134 = vector.broadcast %cst_42 : f32 to vector<8x1xf32>
    %135 = arith.divf %133, %134 : vector<8x1xf32>
    %136 = vector.broadcast %135 : vector<8x1xf32> to vector<8x32xf32>
    %137 = arith.subf %131, %136 : vector<8x32xf32>
    %138 = arith.mulf %137, %137 : vector<8x32xf32>
    %cst_43 = arith.constant dense<0.000000e+00> : vector<8xf32>
    %139 = vector.multi_reduction <add>, %138, %cst_43 [1] : vector<8x32xf32> to vector<8xf32>
    %140 = vector.shape_cast %139 : vector<8xf32> to vector<8x1xf32>
    %cst_44 = arith.constant 3.200000e+01 : f32
    %141 = vector.broadcast %cst_44 : f32 to vector<8x1xf32>
    %142 = arith.divf %140, %141 : vector<8x1xf32>
    %143 = vector.broadcast %135 : vector<8x1xf32> to vector<8x32xf32>
    %144 = arith.subf %131, %143 : vector<8x32xf32>
    %cst_45 = arith.constant 9.99999974E-6 : f32
    %145 = vector.broadcast %cst_45 : f32 to vector<8x1xf32>
    %146 = arith.addf %142, %145 : vector<8x1xf32>
    %147 = math.rsqrt %146 : vector<8x1xf32>
    %148 = vector.broadcast %147 : vector<8x1xf32> to vector<8x32xf32>
    %149 = arith.mulf %144, %148 : vector<8x32xf32>
    %150 = vector.broadcast %2 : vector<1x32xf32> to vector<8x32xf32>
    %151 = arith.mulf %149, %150 : vector<8x32xf32>
    %152 = vector.broadcast %3 : vector<1x32xf32> to vector<8x32xf32>
    %153 = arith.addf %151, %152 : vector<8x32xf32>
    %154 = arith.truncf %153 : vector<8x32xf32> to vector<8x32xbf16>
    %c0_46 = arith.constant 0 : index
    %c0_47 = arith.constant 0 : index
    %155 = vector.load %arg6[%c0_46, %c0_47] : memref<32x64xbf16, #tpu.memory_space<vmem>>, vector<32x64xbf16>
    %cst_48 = arith.constant dense<0.000000e+00> : vector<8x64xf32>
    %156 = tpu.matmul %154, %155, %cst_48 {dimension_numbers = #tpu.dot_dimension_numbers<[1], [0], [0], [1], [0, 0, 1, 1], [], []>} : vector<8x32xbf16>, vector<32x64xbf16>, vector<8x64xf32> -> vector<8x64xf32>
    %157 = vector.broadcast %4 : vector<1x64xf32> to vector<8x64xf32>
    %158 = arith.addf %156, %157 : vector<8x64xf32>
    %cst_49 = arith.constant 0.000000e+00 : f32
    %159 = vector.broadcast %cst_49 : f32 to vector<8x64xf32>
    %160 = arith.maximumf %158, %159 : vector<8x64xf32>
    %161 = arith.truncf %160 : vector<8x64xf32> to vector<8x64xbf16>
    %c0_50 = arith.constant 0 : index
    %c0_51 = arith.constant 0 : index
    %162 = vector.load %arg7[%c0_50, %c0_51] : memref<64x32xbf16, #tpu.memory_space<vmem>>, vector<64x32xbf16>
    %cst_52 = arith.constant dense<0.000000e+00> : vector<8x32xf32>
    %163 = tpu.matmul %161, %162, %cst_52 {dimension_numbers = #tpu.dot_dimension_numbers<[1], [0], [0], [1], [0, 0, 1, 1], [], []>} : vector<8x64xbf16>, vector<64x32xbf16>, vector<8x32xf32> -> vector<8x32xf32>
    %164 = vector.broadcast %5 : vector<1x32xf32> to vector<8x32xf32>
    %165 = arith.addf %163, %164 : vector<8x32xf32>
    %166 = arith.addf %153, %165 : vector<8x32xf32>
    %cst_53 = arith.constant dense<0.000000e+00> : vector<8xf32>
    %167 = vector.multi_reduction <add>, %166, %cst_53 [1] : vector<8x32xf32> to vector<8xf32>
    %168 = vector.shape_cast %167 : vector<8xf32> to vector<8x1xf32>
    %cst_54 = arith.constant 3.200000e+01 : f32
    %169 = vector.broadcast %cst_54 : f32 to vector<8x1xf32>
    %170 = arith.divf %168, %169 : vector<8x1xf32>
    %171 = vector.broadcast %170 : vector<8x1xf32> to vector<8x32xf32>
    %172 = arith.subf %166, %171 : vector<8x32xf32>
    %173 = arith.mulf %172, %172 : vector<8x32xf32>
    %cst_55 = arith.constant dense<0.000000e+00> : vector<8xf32>
    %174 = vector.multi_reduction <add>, %173, %cst_55 [1] : vector<8x32xf32> to vector<8xf32>
    %175 = vector.shape_cast %174 : vector<8xf32> to vector<8x1xf32>
    %cst_56 = arith.constant 3.200000e+01 : f32
    %176 = vector.broadcast %cst_56 : f32 to vector<8x1xf32>
    %177 = arith.divf %175, %176 : vector<8x1xf32>
    %178 = vector.broadcast %170 : vector<8x1xf32> to vector<8x32xf32>
    %179 = arith.subf %166, %178 : vector<8x32xf32>
    %cst_57 = arith.constant 9.99999974E-6 : f32
    %180 = vector.broadcast %cst_57 : f32 to vector<8x1xf32>
    %181 = arith.addf %177, %180 : vector<8x1xf32>
    %182 = math.rsqrt %181 : vector<8x1xf32>
    %183 = vector.broadcast %182 : vector<8x1xf32> to vector<8x32xf32>
    %184 = arith.mulf %179, %183 : vector<8x32xf32>
    %185 = vector.broadcast %6 : vector<1x32xf32> to vector<8x32xf32>
    %186 = arith.mulf %184, %185 : vector<8x32xf32>
    %187 = vector.broadcast %7 : vector<1x32xf32> to vector<8x32xf32>
    %188 = arith.addf %186, %187 : vector<8x32xf32>
    %189 = arith.truncf %188 : vector<8x32xf32> to vector<8x32xbf16>
    %c0_58 = arith.constant 0 : index
    %c0_59 = arith.constant 0 : index
    %190 = vector.load %arg8[%c0_58, %c0_59] : memref<32x128xbf16, #tpu.memory_space<vmem>>, vector<32x128xbf16>
    %cst_60 = arith.constant dense<0.000000e+00> : vector<8x128xf32>
    %191 = tpu.matmul %189, %190, %cst_60 {dimension_numbers = #tpu.dot_dimension_numbers<[1], [0], [0], [1], [0, 0, 1, 1], [], []>} : vector<8x32xbf16>, vector<32x128xbf16>, vector<8x128xf32> -> vector<8x128xf32>
    %192 = vector.broadcast %8 : vector<1x128xf32> to vector<8x128xf32>
    %193 = arith.addf %191, %192 : vector<8x128xf32>
    %c0_61 = arith.constant 0 : index
    %c0_62 = arith.constant 0 : index
    %194 = vector.load %arg9[%c0_61, %c0_62] : memref<8x128xf32, #tpu.memory_space<vmem>>, vector<8x128xf32>
    tpu.vector_store %arg9[%c0_61, %c0_62], %193 {strides = array<i32>} : memref<8x128xf32, #tpu.memory_space<vmem>>, vector<8x128xf32>,
    return
  }
  func.func @transform_0(%arg0: i32) -> (i32, i32) {
    %c0_i32 = arith.constant 0 : i32
    %c0_i32_0 = arith.constant 0 : i32
    return %arg0, %c0_i32 : i32, i32
  }
  func.func @transform_1(%arg0: i32) -> (i32, i32, i32) {
    %c0_i32 = arith.constant 0 : i32
    %c0_i32_0 = arith.constant 0 : i32
    %c0_i32_1 = arith.constant 0 : i32
    return %arg0, %c0_i32, %c0_i32_0 : i32, i32, i32
  }
  func.func @transform_2(%arg0: i32) -> (i32, i32) {
    %c0_i32 = arith.constant 0 : i32
    %c0_i32_0 = arith.constant 0 : i32
    %c0_i32_1 = arith.constant 0 : i32
    return %c0_i32, %c0_i32_0 : i32, i32
  }
  func.func @transform_3(%arg0: i32) -> (i32, i32) {
    %c0_i32 = arith.constant 0 : i32
    %c0_i32_0 = arith.constant 0 : i32
    %c0_i32_1 = arith.constant 0 : i32
    return %c0_i32, %c0_i32_0 : i32, i32
  }
  func.func @transform_4(%arg0: i32) -> (i32, i32) {
    %c0_i32 = arith.constant 0 : i32
    %c0_i32_0 = arith.constant 0 : i32
    %c0_i32_1 = arith.constant 0 : i32
    return %c0_i32, %c0_i32_0 : i32, i32
  }
  func.func @transform_5(%arg0: i32) -> (i32, i32) {
    %c0_i32 = arith.constant 0 : i32
    %c0_i32_0 = arith.constant 0 : i32
    %c0_i32_1 = arith.constant 0 : i32
    return %c0_i32, %c0_i32_0 : i32, i32
  }
  func.func @transform_6(%arg0: i32) -> (i32, i32) {
    %c0_i32 = arith.constant 0 : i32
    %c0_i32_0 = arith.constant 0 : i32
    %c0_i32_1 = arith.constant 0 : i32
    return %c0_i32, %c0_i32_0 : i32, i32
  }
  func.func @transform_7(%arg0: i32) -> (i32, i32) {
    %c0_i32 = arith.constant 0 : i32
    %c0_i32_0 = arith.constant 0 : i32
    %c0_i32_1 = arith.constant 0 : i32
    return %c0_i32, %c0_i32_0 : i32, i32
  }
  func.func @transform_8(%arg0: i32) -> (i32, i32) {
    %c0_i32 = arith.constant 0 : i32
    %c0_i32_0 = arith.constant 0 : i32
    return %arg0, %c0_i32 : i32, i32
  }
}

</mosaic_0001>

<bundles_post_ra>
// kernel: language_model_forward.1
= control target key start
LH: loop header
LB: loop body
LE: loop exit
PB: predicated region body
PF: predicated region fallthrough
CT: control target
= control target key end

     0   :  { %s1553_s27 = smov 0   ;;  %s1754_s0 = inlined_call_operand.vmem [shape: f32[16,32], index: 0, kind: input, shape index: {}]   ;;  %s1755_s1 = inlined_call_operand.vmem [shape: s32[2,1,8], index: 1, kind: input, shape index: {}]   ;;  %s1756_s2 = inlined_call_operand.vmem [shape: f32[9,128], index: 2, kind: input, shape index: {}]   ;;  %s1757_s3 = inlined_call_operand.vmem [shape: bf16[32,96], index: 3, kind: input, shape index: {}]   ;;  %s1758_s4 = inlined_call_operand.vmem [shape: bf16[32,32], index: 4, kind: input, shape index: {}]   ;;  %s1759_s5 = inlined_call_operand.vmem [shape: bf16[32,64], index: 5, kind: input, shape index: {}]   ;;  %s1760_s6 = inlined_call_operand.vmem [shape: bf16[64,32], index: 6, kind: input, shape index: {}]   ;;  %s1761_s7 = inlined_call_operand.vmem [shape: bf16[32,128], index: 7, kind: input, shape index: {}]   ;;  %s1762_s8 = inlined_call_operand.vmem [shape: f32[16,128], index: 8, kind: output, shape index: {}]  }
   0x1 LB: > { %s1258_s28 = sadd.s32 4294967295, %s1489_s27   ;;  %p1262_p0 = scmp.ge.s32.totalorder %s1489_s27, 1  ;;  %s1489_s27 = sphi %s1553_s27, %s18_s27  }
   0x2   : > { %p269_p1 = scmp.lt.s32.totalorder %s1489_s27, 3 }
   0x4   : > { %p270_p2 = pnand %p1262_p0, %p269_p1 }
   0x5   : > { %p304_p3 = scmp.lt.s32.totalorder (!%p270_p2), %s1258_s28, 1  ;;  %s1493_s17 = smov (!%p270_p2), 120  }
   0x6   : > { %273 = sbr.rel (%p270_p2) target bundleno = 2634 (0xa4a), region = 52  ;;  %s1494_s18 = smov (!%p270_p2), 96  }
   0x7   : > { %s1495_s19 = smov (!%p270_p2), 80   ;;  %s1496_s20 = smov (!%p270_p2), 88  }
   0x8   : > { %s1497_s21 = smov (!%p270_p2), 72   ;;  %s1498_s22 = smov (!%p270_p2), 112  }
   0x9   : > { %s1499_s23 = smov (!%p270_p2), 104   ;;  %s1501_s29 = smov (!%p270_p2), 56  }
   0xa   : > { %s1502_s30 = smov (!%p270_p2), 64   ;;  %s1503_s9 = smov (!%p270_p2), 40  }
   0xb   : > { %v1451_v0 = vld [vmem:[%s1757_s3 + $0x8] sm:$0xff]   ;;  %v1491_v1 = vmov 0.0   ;;  %v1452_v2 = vld [vmem:[%s1757_s3] sm:$0xff]   ;;  %vm1492_vm0 = vmmov 0   ;;  %s1766_s28 = smov (!%p304_p3, %s1258_s28), 1  ;;  %vm347_vm1 = vcmask 261120   ;;  %v392_v23 = vlaneseq }
   0xc   : > { %1334 = vmatprep.subr.bf16.mxu0 %v1491_v1  ;;  %1342 = vmatprep.subr.bf16.mxu1 %v1491_v1  ;;  %s1263_s11 = sshll.u32 %s1766_s28, 3  ;;  %v1265_v5 = vld [vmem:[%s1756_s2] ss:$0 sm:$0xff]  ;;  %vm409_vm2 = vcmask 64512   ;;  %s310_s26 = scalar_lea.vmem %s1755_s1, %s1766_s28  ;;  %v1500_v27 = vmov 0   ;;  %vm475_vm7 = vcmask 1043456  }
   0xd   : > { %1335 = vmatpush3.bf16.msra.mxu0 %v1451_v0  ;;  %1338 = vmatprep.mubr.msk.bf16.mxu0 %vm1492_vm0, %v1491_v1  ;;  %s307_s14 = scalar_lea.vmem %s1754_s0, %s1263_s11  ;;  %v397_v24 = vld [vmem:[%s310_s26] sm:$0x1]  ;;  %v393_v25 = vshrl.u32 %v392_v23, 7  ;;  %v395_v29 = vand.u32 127, %v392_v23  ;;  %s1504_s10 = smov 48   ;;  %vm868_vm8 = vcmask 130048  }
   0xe   : > { %1336 = vmatprep.subr.bf16.mxu0 %v1491_v1  ;;  %1344 = vmatprep.mubr.msk.bf16.mxu1 %vm1492_vm0, %v1491_v1  ;;  %v1583_v3 = vld [vmem:[%s307_s14] sm:$0xff]  ;;  %vm398_vm3 = vcmp.eq.s32.totalorder %v397_v24, 0  ;;  %s1505_s12 = smov 8   ;;  %vm870_vm9 = vcmask 195584   ;;  %vm1063_vm10 = vcmask 523264   ;;  %s314_s15 = scalar_lea.vmem %s1762_s8, %s1263_s11 }
   0xf   : > { %v326_v4 = vpack.c.bf16 %v1583_v3, %v1583_v3  ;;  %v402_v26 = vsub.s32 0, %v393_v25  ;;  %v399_v28 = vsel %vm398_vm3, 1, %v1500_v27  ;;  %vm396_vm4 = vcmp.le.s32.totalorder %v395_v29, %v393_v25 }
  0x11   : > { %1337 = vmatpush3.bf16.msra.mxu0 %v1452_v2  ;;  %v403_v30 = vrot.slane %v399_v28, %v402_v26 }
  0x12   : > { %1348 = vmatprep.subr.bf16.mxu0 %v1491_v1 }
  0x13   : > { %vm404_vm5 = vcmp.eq.s32.totalorder %v403_v30, 1 }
  0x14   : > { %1339 = vmatmul.mubr.msk.bf16.vlgmr.msra.gmra.mxu0 %vm347_vm1, %v326_v4  ;;  %vm1627_vm6 = vmand %vm396_vm4, %vm404_vm5 }
  0x15   : > { %1350 = vmatprep.mubr.msk.bf16.mxu0 %vm1492_vm0, %v1491_v1 }
  0xd4   : > { %v385_v6 = vpop.f32.mrf.mxu0 }
  0xd5   : > { %v386_v7 = vadd.f32 %v1265_v5, %v385_v6 }
  0xd6   : > { %v1340_v8 = vpop.f32.mrf.mxu0 }
  0xd7   : > { %v1593_v9 = vpack.c.bf16 %v386_v7, %v386_v7 }
  0xd8   : > { %v388_v10 = vpop.f32.mrf.mxu0 }
  0xd9   : > { %519 = vrot.lane.b32.xlu1 %v1593_v9, %s1493_s17  ;;  %407 = vrot.lane.b32.xlu0 %v1593_v9, %s1494_s18  ;;  %s1506_s17 = smov 16   ;;  %s1507_s18 = smov 24  }
  0xda   : > { %v1341_v11 = vpop.f32.mrf.mxu0 }
  0xdd   : > { %633 = vrot.lane.b32.xlu1 %v1593_v9, %s1495_s19  ;;  %521 = vrot.lane.b32.xlu0 %v1593_v9, %s1496_s20 }
  0xe1   : > { %745 = vrot.lane.b32.xlu1 %v1593_v9, %s1497_s21  ;;  %631 = vrot.lane.b32.xlu0 %v1593_v9, %s1498_s22 }
  0xe5   : > { %743 = vrot.lane.b32.xlu0 %v1593_v9, %s1499_s23 }
 0x14b   : > { %v408_v12 = vpop.permute.xlu0 %407  ;;  %v520_v15 = vpop.permute.xlu1 %519 }
 0x14c   : > { %v414_v13 = vsel %vm409_vm2, %v408_v12, 0 }
 0x14d   : > { %1343 = vmatpush3.bf16.xpose.msra.mxu1 %v414_v13 }
 0x14e   : > { %1354 = vmatprep.subr.bf16.mxu1 %v1491_v1 }
 0x14f   : > { %v522_v14 = vpop.permute.xlu0 %521  ;;  %v634_v17 = vpop.permute.xlu1 %633 }
 0x150   : > { %v527_v16 = vsel %vm409_vm2, %v522_v14, 0  ;;  %v639_v18 = vsel %vm409_vm2, %v634_v17, 0 }
 0x153   : > { %v746_v19 = vpop.permute.xlu1 %745  ;;  %v632_v20 = vpop.permute.xlu0 %631 }
 0x154   : > { %1345 = vmatmul.mubr.msk.bf16.vlgmr.msra.gmra.mxu1 %vm409_vm2, %v1593_v9  ;;  %v751_v21 = vsel %vm409_vm2, %v746_v19, 0 }
 0x155   : > { %1355 = vmatpush3.bf16.xpose.msra.mxu1 %v527_v16  ;;  %1356 = vmatprep.mubr.msk.bf16.mxu1 %vm1492_vm0, %v1491_v1 }
 0x156   : > { %1366 = vmatprep.subr.bf16.mxu1 %v1491_v1 }
 0x157   : > { %v744_v22 = vpop.permute.xlu0 %743 }
 0x15c   : > { %1357 = vmatmul.mubr.msk.bf16.vlgmr.msra.gmra.mxu1 %vm409_vm2, %v520_v15 }
 0x15d   : > { %1367 = vmatpush3.bf16.xpose.msra.mxu1 %v639_v18  ;;  %1368 = vmatprep.mubr.msk.bf16.mxu1 %vm1492_vm0, %v1491_v1 }
 0x15e   : > { %1378 = vmatprep.subr.bf16.mxu1 %v1491_v1 }
 0x164   : > { %1369 = vmatmul.mubr.msk.bf16.vlgmr.msra.gmra.mxu1 %vm409_vm2, %v632_v20 }
 0x165   : > { %1379 = vmatpush3.bf16.xpose.msra.mxu1 %v751_v21  ;;  %1380 = vmatprep.mubr.msk.bf16.mxu1 %vm1492_vm0, %v1491_v1 }
 0x166   : > { %1390 = vmatprep.subr.bf16.mxu1 %v1491_v1 }
 0x16c   : > { %1381 = vmatmul.mubr.msk.bf16.vlgmr.msra.gmra.mxu1 %vm409_vm2, %v744_v22 }
 0x16d   : > { %1394 = vmatprep.mubr.msk.bf16.mxu1 %vm1492_vm0, %v1491_v1 }
 0x214   : > { %v450_v31 = vpop.f32.mrf.mxu1 }
 0x215   : > { %v456_v33 = vmul.f32 0.35355338, %v450_v31 }
 0x216   : > { %v1346_v34 = vpop.f32.mrf.mxu1 }
 0x217   : > { %v457_v35 = vsel %vm1627_vm6, %v456_v33, -1e+30 }
 0x218   : > { %v453_v36 = vpop.f32.mrf.mxu1  ;;  %v458_v37 = vsel %vm409_vm2, %v457_v35, -inf }
 0x219   : > { %459 = vmax.xlane.f32.xlu1 %v458_v37 }
 0x21a   : > { %v1347_v38 = vpop.f32.mrf.mxu1 }
 0x21c   : > { %v563_v39 = vpop.f32.mrf.mxu1 }
 0x21d   : > { %v569_v40 = vmul.f32 0.35355338, %v563_v39 }
 0x21e   : > { %v1358_v41 = vpop.f32.mrf.mxu1 }
 0x21f   : > { %v570_v42 = vsel %vm1627_vm6, %v569_v40, -1e+30 }
 0x220   : > { %v566_v43 = vpop.f32.mrf.mxu1  ;;  %v571_v44 = vsel %vm409_vm2, %v570_v42, -inf }
 0x221   : > { %572 = vmax.xlane.f32.xlu0 %v571_v44 }
 0x222   : > { %v1359_v45 = vpop.f32.mrf.mxu1 }
 0x224   : > { %v675_v46 = vpop.f32.mrf.mxu1 }
 0x225   : > { %v681_v47 = vmul.f32 0.35355338, %v675_v46 }
 0x226   : > { %v1370_v48 = vpop.f32.mrf.mxu1 }
 0x227   : > { %v682_v49 = vsel %vm1627_vm6, %v681_v47, -1e+30 }
 0x228   : > { %v678_v50 = vpop.f32.mrf.mxu1  ;;  %v683_v51 = vsel %vm409_vm2, %v682_v49, -inf }
 0x229   : > { %684 = vmax.xlane.f32.xlu0 %v683_v51  ;;  %v1453_v50 = vld [vmem:[%s1758_s4 + $0x8] sm:$0xff]   ;;  %v1454_v51 = vld [vmem:[%s1758_s4] sm:$0xff]  }
 0x22a   : > { %v1371_v52 = vpop.f32.mrf.mxu1  ;;  %1391 = vmatpush3.bf16.msra.mxu1 %v1453_v50 }
 0x22b   : > { %1392 = vmatprep.subr.bf16.mxu1 %v1491_v1 }
 0x22c   : > { %v787_v53 = vpop.f32.mrf.mxu1 }
 0x22d   : > { %v793_v54 = vmul.f32 0.35355338, %v787_v53 }
 0x22e   : > { %v1382_v55 = vpop.f32.mrf.mxu1  ;;  %1393 = vmatpush3.bf16.msra.mxu1 %v1454_v51 }
 0x22f   : > { %v794_v56 = vsel %vm1627_vm6, %v793_v54, -1e+30  ;;  %1406 = vmatprep.subr.bf16.mxu1 %v1491_v1 }
 0x230   : > { %v790_v57 = vpop.f32.mrf.mxu1  ;;  %v795_v58 = vsel %vm409_vm2, %v794_v56, -inf }
 0x231   : > { %796 = vmax.xlane.f32.xlu1 %v795_v58 }
 0x232   : > { %v1383_v59 = vpop.f32.mrf.mxu1 }
 0x2a2   : > { %v460_v60 = vpop.xlane.xlu1 %459 }
 0x2a3   : > { %v461_v61 = vsub.f32 %v457_v35, %v460_v60 }
 0x2a5   : > { %v462_v62 = vmul.f32 1.442695, %v461_v61 }
 0x2a7   : > { %1463 = vpow2.f32 %v462_v62 }
 0x2aa   : > { %v573_v63 = vpop.xlane.xlu0 %572 }
 0x2ab   : > { %v574_v0 = vsub.f32 %v570_v42, %v573_v63 }
 0x2ad   : > { %v575_v2 = vmul.f32 1.442695, %v574_v0 }
 0x2af   : > { %1465 = vpow2.f32 %v575_v2 }
 0x2b2   : > { %v685_v4 = vpop.xlane.xlu0 %684 }
 0x2b3   : > { %v686_v5 = vsub.f32 %v682_v49, %v685_v4 }
 0x2b4   : > { %v1464_v6 = vpop.eup %1463 }
 0x2b5   : > { %v687_v7 = vmul.f32 1.442695, %v686_v5  ;;  %v464_v8 = vsel %vm409_vm2, %v1464_v6, 0.0  ;;  %v1277_v5 = vld [vmem:[%s1756_s2 + $0x1] ss:$0 sm:$0xff] }
 0x2b6   : > { %465 = vadd.xlane.f32.xlu0 %v464_v8 }
 0x2b7   : > { %1467 = vpow2.f32 %v687_v7 }
 0x2ba   : > { %v797_v14 = vpop.xlane.xlu1 %796 }
 0x2bb   : > { %v798_v15 = vsub.f32 %v794_v56, %v797_v14 }
 0x2bc   : > { %v1466_v10 = vpop.eup %1465 }
 0x2bd   : > { %v577_v11 = vsel %vm409_vm2, %v1466_v10, 0.0  ;;  %v799_v16 = vmul.f32 1.442695, %v798_v15 }
 0x2be   : > { %578 = vadd.xlane.f32.xlu1 %v577_v11 }
 0x2bf   : > { %1469 = vpow2.f32 %v799_v16 }
 0x2c4   : > { %v1468_v12 = vpop.eup %1467 }
 0x2c5   : > { %v689_v13 = vsel %vm409_vm2, %v1468_v12, 0.0 }
 0x2c6   : > { %690 = vadd.xlane.f32.xlu0 %v689_v13 }
 0x2cc   : > { %v1470_v17 = vpop.eup %1469 }
 0x2cd   : > { %v801_v18 = vsel %vm409_vm2, %v1470_v17, 0.0 }
 0x2cf   : > { %583 = vrot.lane.b32.xlu1 %v1593_v9, %s1501_s29 }
 0x2dc   : > { %470 = vrot.lane.b32.xlu0 %v1593_v9, %s1502_s30 }
 0x2e0   : > { %807 = vrot.lane.b32.xlu0 %v1593_v9, %s1503_s9 }
 0x2f3   : > { %802 = vadd.xlane.f32.xlu1 %v801_v18 }
 0x304   : > { %695 = vrot.lane.b32.xlu1 %v1593_v9, %s1504_s10 }
 0x33f   : > { %v466_v19 = vpop.xlane.xlu0 %465 }
 0x340   : > { %1471 = vrcp.f32 %v466_v19  ;;  %v1455_v19 = vld [vmem:[%s1759_s5 + $0x8] sm:$0xff]  }
 0x347   : > { %v579_v20 = vpop.xlane.xlu1 %578 }
 0x348   : > { %1473 = vrcp.f32 %v579_v20  ;;  %v1457_v20 = vld [vmem:[%s1760_s6 + $0x18] sm:$0xff]  }
 0x34b   : > { %v584_v26 = vpop.permute.xlu1 %583 }
 0x34c   : > { %v589_v29 = vsel %vm475_vm7, %v584_v26, 0  ;;  %v1281_v26 = vld [vmem:[%s1756_s2 + $0x2] ss:$0 sm:$0xff] }
 0x34d   : > { %v1472_v21 = vpop.eup %1471 }
 0x34e   : > { %v468_v23 = vmul.f32 %v1472_v21, %v1464_v6  ;;  %v1458_v21 = vld [vmem:[%s1760_s6 + $0x10] sm:$0xff]  }
 0x34f   : > { %v691_v22 = vpop.xlane.xlu0 %690 }
 0x350   : > { %v469_v27 = vpack.c.bf16 %v468_v23, %v468_v23  ;;  %1475 = vrcp.f32 %v691_v22 }
 0x353   : > { %v471_v24 = vpop.permute.xlu0 %470 }
 0x354   : > { %v477_v25 = vsel %vm475_vm7, %v471_v24, 0 }
 0x355   : > { %1349 = vmatpush3.bf16.msra.mxu0 %v477_v25  ;;  %v1474_v28 = vpop.eup %1473 }
 0x356   : > { %1360 = vmatprep.subr.bf16.mxu0 %v1491_v1  ;;  %v581_v9 = vmul.f32 %v1474_v28, %v1466_v10  ;;  %v1282_v28 = vld [vmem:[%s1756_s2 + $0x3] ss:$0 sm:$0xff] }
 0x357   : > { %v808_v36 = vpop.permute.xlu0 %807 }
 0x358   : > { %1351 = vmatmul.mubr.msk.bf16.vlgmr.msra.gmra.mxu0 %vm409_vm2, %v469_v27  ;;  %v582_v30 = vpack.c.bf16 %v581_v9, %v581_v9  ;;  %v813_v38 = vsel %vm475_vm7, %v808_v36, 0 }
 0x359   : > { %1361 = vmatpush3.bf16.msra.mxu0 %v589_v29  ;;  %1362 = vmatprep.mubr.msk.bf16.mxu0 %vm1492_vm0, %v1491_v1 }
 0x35a   : > { %1372 = vmatprep.subr.bf16.mxu0 %v1491_v1 }
 0x35d   : > { %v1476_v31 = vpop.eup %1475 }
 0x35e   : > { %v693_v33 = vmul.f32 %v1476_v31, %v1468_v12  ;;  %v1459_v31 = vld [vmem:[%s1760_s6 + $0x8] sm:$0xff]  }
 0x360   : > { %1363 = vmatmul.mubr.msk.bf16.vlgmr.msra.gmra.mxu0 %vm409_vm2, %v582_v30  ;;  %v694_v37 = vpack.c.bf16 %v693_v33, %v693_v33  ;;  %v1283_v33 = vld [vmem:[%s1756_s2 + $0x4] ss:$0 sm:$0xff] }
 0x361   : > { %1374 = vmatprep.mubr.msk.bf16.mxu0 %vm1492_vm0, %v1491_v1 }
 0x37c   : > { %v803_v32 = vpop.xlane.xlu1 %802 }
 0x37d   : > { %1477 = vrcp.f32 %v803_v32  ;;  %v1460_v32 = vld [vmem:[%s1760_s6] sm:$0xff]  }
 0x380   : > { %v696_v34 = vpop.permute.xlu1 %695 }
 0x381   : > { %v701_v35 = vsel %vm475_vm7, %v696_v34, 0 }
 0x382   : > { %1373 = vmatpush3.bf16.msra.mxu0 %v701_v35 }
 0x383   : > { %1384 = vmatprep.subr.bf16.mxu0 %v1491_v1 }
 0x385   : > { %1375 = vmatmul.mubr.msk.bf16.vlgmr.msra.gmra.mxu0 %vm409_vm2, %v694_v37 }
 0x386   : > { %1385 = vmatpush3.bf16.msra.mxu0 %v813_v38  ;;  %1386 = vmatprep.mubr.msk.bf16.mxu0 %vm1492_vm0, %v1491_v1 }
 0x387   : > { %1398 = vmatprep.subr.bf16.mxu0 %v1491_v1 }
 0x38a   : > { %v1478_v39 = vpop.eup %1477 }
 0x38b   : > { %v805_v40 = vmul.f32 %v1478_v39, %v1470_v17 }
 0x38d   : > { %v806_v41 = vpack.c.bf16 %v805_v40, %v805_v40 }
 0x38f   : > { %1387 = vmatmul.mubr.msk.bf16.vlgmr.msra.gmra.mxu0 %vm409_vm2, %v806_v41  ;;  %v1287_v41 = vld [vmem:[%s1756_s2 + $0x5] ss:$0 sm:$0xff] }
 0x390   : > { %1402 = vmatprep.mubr.msk.bf16.mxu0 %vm1492_vm0, %v1491_v1  ;;  %1399 = vmatpush3.bf16.msra.mxu0 %v1455_v19 }
 0x391   : > { %1400 = vmatprep.subr.bf16.mxu0 %v1491_v1 }
 0x418   : > { %v513_v42 = vpop.f32.mrf.mxu0 }
 0x41a   : > { %v1352_v43 = vpop.f32.mrf.mxu0 }
 0x41c   : > { %v516_v44 = vpop.f32.mrf.mxu0 }
 0x41e   : > { %v1353_v45 = vpop.f32.mrf.mxu0 }
 0x420   : > { %v625_v46 = vpop.f32.mrf.mxu0 }
 0x421   : > { %856 = vrot.lane.b32.xlu1 %v625_v46, %s1505_s12 }
 0x422   : > { %v1364_v47 = vpop.f32.mrf.mxu0 }
 0x424   : > { %v628_v48 = vpop.f32.mrf.mxu0 }
 0x426   : > { %v1365_v49 = vpop.f32.mrf.mxu0 }
 0x445   : > { %v737_v52 = vpop.f32.mrf.mxu0 }
 0x446   : > { %860 = vrot.lane.b32.xlu0 %v737_v52, %s1506_s17 }
 0x447   : > { %v1376_v53 = vpop.f32.mrf.mxu0 }
 0x449   : > { %v740_v54 = vpop.f32.mrf.mxu0 }
 0x44a   : > { %v1461_v54 = vld [vmem:[%s1761_s7 + $0x8] sm:$0xff]  }
 0x44b   : > { %v1377_v55 = vpop.f32.mrf.mxu0 }
 0x44c   : > { %v1462_v55 = vld [vmem:[%s1761_s7] sm:$0xff]  }
 0x44f   : > { %v849_v56 = vpop.f32.mrf.mxu0 }
 0x450   : > { %864 = vrot.lane.b32.xlu1 %v849_v56, %s1507_s18 }
 0x451   : > { %v1388_v57 = vpop.f32.mrf.mxu0 }
 0x453   : > { %v852_v58 = vpop.f32.mrf.mxu0 }
 0x455   : > { %v1389_v59 = vpop.f32.mrf.mxu0 }
 0x493   : > { %v857_v60 = vpop.permute.xlu1 %856 }
 0x494   : > { %v867_v62 = vsel %vm409_vm2, %v513_v42, %v857_v60  ;;  %v1293_v60 = vld [vmem:[%s1756_s2 + $0x6] ss:$0 sm:$0xff] }
 0x4b8   : > { %v861_v61 = vpop.permute.xlu0 %860 }
 0x4b9   : > { %v869_v63 = vsel %vm868_vm8, %v867_v62, %v861_v61  ;;  %v1294_v62 = vld [vmem:[%s1756_s2 + $0x7] ss:$0 sm:$0xff] }
 0x4c2   : > { %v865_v0 = vpop.permute.xlu1 %864 }
 0x4c3   : > { %v871_v2 = vsel %vm870_vm9, %v869_v63, %v865_v0 }
 0x4c4   : > { %v872_v4 = vpack.c.bf16 %v871_v2, %v871_v2 }
 0x4c6   : > { %1395 = vmatmul.mubr.msk.bf16.vlgmr.msra.gmra.mxu1 %vm347_vm1, %v872_v4 }
 0x4c7   : > { %1414 = vmatprep.mubr.msk.bf16.mxu1 %vm1492_vm0, %v1491_v1  ;;  %1407 = vmatpush3.bf16.msra.mxu1 %v1457_v20 }
 0x4c8   : > { %1408 = vmatprep.subr.bf16.mxu1 %v1491_v1 }
 0x4cb   : > { %1409 = vmatpush3.bf16.msra.mxu1 %v1458_v21 }
 0x4cc   : > { %1410 = vmatprep.subr.bf16.mxu1 %v1491_v1 }
 0x4cf   : > { %1411 = vmatpush3.bf16.msra.mxu1 %v1459_v31 }
 0x4d0   : > { %1412 = vmatprep.subr.bf16.mxu1 %v1491_v1 }
 0x4d3   : > { %1413 = vmatpush3.bf16.msra.mxu1 %v1460_v32 }
 0x586   : > { %v930_v6 = vpop.f32.mrf.mxu1 }
 0x587   : > { %v931_v7 = vadd.f32 %v1277_v5, %v930_v6 }
 0x588   : > { %v1396_v8 = vpop.f32.mrf.mxu1 }
 0x589   : > { %v936_v10 = vadd.f32 %v931_v7, %v1583_v3  ;;  %v1456_v3 = vld [vmem:[%s1759_s5] sm:$0xff]  }
 0x58a   : > { %v933_v11 = vpop.f32.mrf.mxu1  ;;  %1401 = vmatpush3.bf16.msra.mxu0 %v1456_v3 }
 0x58b   : > { %v937_v12 = vsel %vm347_vm1, %v936_v10, 0.0  ;;  %1418 = vmatprep.subr.bf16.mxu0 %v1491_v1 }
 0x58c   : > { %938 = vadd.xlane.f32.xlu0 %v937_v12  ;;  %v1397_v13 = vpop.f32.mrf.mxu1 }
 0x615   : > { %v939_v14 = vpop.xlane.xlu0 %938 }
 0x616   : > { %v941_v15 = vmul.f32 0.03125, %v939_v14 }
 0x618   : > { %v942_v16 = vsub.f32 %v936_v10, %v941_v15 }
 0x61a   : > { %v943_v17 = vmul.f32 %v942_v16, %v942_v16 }
 0x61c   : > { %v944_v18 = vsel %vm347_vm1, %v943_v17, 0.0 }
 0x61d   : > { %945 = vadd.xlane.f32.xlu1 %v944_v18 }
 0x6a6   : > { %v946_v22 = vpop.xlane.xlu1 %945 }
 0x6a7   : > { %v947_v23 = vmul.f32 0.03125, %v946_v22 }
 0x6a9   : > { %v948_v24 = vadd.f32 1e-05, %v947_v23 }
 0x6ab   : > { %1479 = vrsqrt.f32 %v948_v24 }
 0x6b8   : > { %v1480_v25 = vpop.eup %1479 }
 0x6b9   : > { %v950_v27 = vmul.f32 %v1480_v25, %v942_v16 }
 0x6bb   : > { %v955_v29 = vmul.f32 %v1281_v26, %v950_v27 }
 0x6bd   : > { %v960_v9 = vadd.f32 %v1282_v28, %v955_v29 }
 0x6bf   : > { %v961_v30 = vpack.c.bf16 %v960_v9, %v960_v9 }
 0x6c1   : > { %1403 = vmatmul.mubr.msk.bf16.vlgmr.msra.gmra.mxu0 %vm347_vm1, %v961_v30 }
 0x6c2   : > { %1422 = vmatprep.mubr.msk.bf16.mxu0 %vm1492_vm0, %v1491_v1  ;;  %1419 = vmatpush3.bf16.msra.mxu0 %v1461_v54 }
 0x6c3   : > { %1420 = vmatprep.subr.bf16.mxu0 %v1491_v1  ;;  %v1295_v1 = vld [vmem:[%s1756_s2 + $0x8] ss:$0 sm:$0xff] }
 0x6c6   : > { %1421 = vmatpush3.bf16.msra.mxu0 %v1462_v55 }
 0x781   : > { %v1019_v34 = vpop.f32.mrf.mxu0 }
 0x782   : > { %v1020_v35 = vadd.f32 %v1283_v33, %v1019_v34 }
 0x783   : > { %v1404_v36 = vpop.f32.mrf.mxu0 }
 0x784   : > { %v1025_v37 = vmax.f32 %v1020_v35, 0.0 }
 0x785   : > { %v1022_v38 = vpop.f32.mrf.mxu0 }
 0x786   : > { %v1026_v39 = vpack.c.bf16 %v1025_v37, %v1025_v37 }
 0x787   : > { %v1405_v40 = vpop.f32.mrf.mxu0 }
 0x788   : > { %1415 = vmatmul.mubr.msk.bf16.vlgmr.msra.gmra.mxu1 %vm1063_vm10, %v1026_v39 }
 0x848   : > { %v1101_v42 = vpop.f32.mrf.mxu1 }
 0x849   : > { %v1102_v43 = vadd.f32 %v1287_v41, %v1101_v42 }
 0x84a   : > { %v1416_v44 = vpop.f32.mrf.mxu1 }
 0x84b   : > { %v1107_v45 = vadd.f32 %v1102_v43, %v960_v9 }
 0x84c   : > { %v1104_v46 = vpop.f32.mrf.mxu1 }
 0x84d   : > { %v1108_v47 = vsel %vm347_vm1, %v1107_v45, 0.0 }
 0x84e   : > { %1109 = vadd.xlane.f32.xlu0 %v1108_v47  ;;  %v1417_v48 = vpop.f32.mrf.mxu1 }
 0x8d7   : > { %v1110_v49 = vpop.xlane.xlu0 %1109 }
 0x8d8   : > { %v1111_v50 = vmul.f32 0.03125, %v1110_v49 }
 0x8da   : > { %v1112_v51 = vsub.f32 %v1107_v45, %v1111_v50 }
 0x8dc   : > { %v1113_v52 = vmul.f32 %v1112_v51, %v1112_v51 }
 0x8de   : > { %v1114_v53 = vsel %vm347_vm1, %v1113_v52, 0.0 }
 0x8df   : > { %1115 = vadd.xlane.f32.xlu0 %v1114_v53 }
 0x968   : > { %v1116_v56 = vpop.xlane.xlu0 %1115 }
 0x969   : > { %v1117_v57 = vmul.f32 0.03125, %v1116_v56 }
 0x96b   : > { %v1118_v58 = vadd.f32 1e-05, %v1117_v57 }
 0x96d   : > { %1481 = vrsqrt.f32 %v1118_v58 }
 0x97a   : > { %v1482_v59 = vpop.eup %1481 }
 0x97b   : > { %v1120_v61 = vmul.f32 %v1482_v59, %v1112_v51 }
 0x97d   : > { %v1125_v63 = vmul.f32 %v1293_v60, %v1120_v61 }
 0x97f   : > { %v1130_v0 = vadd.f32 %v1294_v62, %v1125_v63 }
 0x981   : > { %v1131_v2 = vpack.c.bf16 %v1130_v0, %v1130_v0 }
 0x983   : > { %1423 = vmatmul.mubr.msk.bf16.vlgmr.msra.gmra.mxu0 %vm347_vm1, %v1131_v2 }
 0xa43   : > { %v1189_v4 = vpop.f32.mrf.mxu0 }
 0xa44   : > { %v1190_v5 = vadd.f32 %v1295_v1, %v1189_v4 }
 0xa45   : > { %v1424_v6 = vpop.f32.mrf.mxu0 }
 0xa46   : > { %1195 = vst [vmem:[%s314_s15] sm:$0xff] %v1190_v5 }
 0xa47   : > { %v1192_v7 = vpop.f32.mrf.mxu0 }
 0xa49   : > { %v1425_v8 = vpop.f32.mrf.mxu0 }
 0xa4a PF: > { %s18_s27 = sadd.s32 1, %s1489_s27  }
 0xa4b   : > { %p15_p4 = scmp.ge.s32.totalorder %s18_s27, 4  }
 0xa4d   :  { %17 = sbr.rel (!%p15_p4) target bundleno = 1 (0x1), region = 85 }

</bundles_post_ra>
